<compile_context>
chip_gen: v5e
topology: v5e:2x2
jax: 0.10.0
libtpu: 0.0.40
codegen_flags: <defaults>
</compile_context>

<pallas_src>
import jax
import jax.numpy as jnp
from jax.experimental import pallas as pl
from jax.experimental.pallas import tpu as pltpu

LANES = 128
NUM_BITS = 8
NUM_BINS = float(2 ** NUM_BITS - 1)   # 255
QN = 0.0                              # Preconditioner.Qn
QP = NUM_BINS                         # Preconditioner.Qp (asymmetric activation quantizer)
EPS = 1e-8

_NCORES = 2                           # manual megacore split of the min/max reduction pass
_TARGET_TILE_BYTES = 2 * 1024 * 1024  # ~2 MiB streaming tiles (HBM-roofline plateau)


# ----------------------------------------------------------------------------- helpers
def _cdiv(a, b):
    return -(-a // b)


def _round_up(a, b):
    return _cdiv(a, b) * b


def _vmem_budget_bytes():
    """Generation-aware scoped-VMEM budget: ~96 MiB on v5e/v6e (128 MiB), ~48 MiB on v7x (64 MiB)."""
    cap = 64 * 1024 * 1024  # conservative fallback (v7x per-TensorCore VMEM)
    try:
        info = pltpu.get_tpu_info()
        cap = int(getattr(info, "vmem_capacity_bytes", cap) or cap)
    except Exception:
        pass
    return min((cap * 3) // 4, 96 * 1024 * 1024)


def _lane_dense_cols(n):
    """Largest lane-dense (multiple-of-128) column count that evenly divides n."""
    for c in (2048, 1024, 512, 256, 128):
        if n % c == 0:
            return c
    return None


def _best_2d_view(x):
    """Lane-dense 2D view for the fused path. Contiguous reshape only — never a copy."""
    n = x.size
    c = _lane_dense_cols(n)
    if c is not None:
        return x.reshape(n // c, c)
    for c in (1024, 512, 256, 128, 64, 32, 16, 8):   # sublane-dense fallback
        if n % c == 0:
            return x.reshape(n // c, c)
    if x.ndim >= 2 and x.shape[0] > 1:
        return x.reshape(x.shape[0], -1)              # widest possible (ragged) last dim
    return x.reshape(1, n)


# ----------------------------------------------------------------------------- kernels
def _fake_quant(x_f32, mn, mx):
    """Shared quantize -> clamp -> round -> dequantize math (f32, scalar params hoisted)."""
    scale = NUM_BINS / (mx - mn)
    inv_scale = (mx - mn) / NUM_BINS           # scalar; replaces per-element divide with a vmul
    q = jnp.round(jnp.clip((x_f32 - mn) * scale, QN, QP))  # round-half-to-even == torch.round_
    return q * inv_scale + mn


def _fused_kernel(x_ref, o_ref):
    """Single-pass path: whole tensor VMEM-resident; min/max + quantize in one kernel."""
    x = x_ref[...].astype(jnp.float32)
    mn = jnp.min(x) - EPS
    mx = jnp.max(x) + EPS
    o_ref[...] = _fake_quant(x, mn, mx).astype(o_ref.dtype)


def _make_minmax_kernel(nb, spc, tail_rows):
    """Pass 1 (tiled path): per-core running min/max into a tiny resident (1,8,128) output block.

    Per step: tile -> vreg-tree min/max (VALU) -> one-vreg XLU reduce -> fold into the resident
    output block. No full-tile accumulators, so accumulator ld/st traffic is ~1 vreg/step.
    If the last row-block is partial, its padded rows are masked with +inf/-inf neutrals.
    """
    def kernel(x_ref, pmn_ref, pmx_ref):
        c = pl.program_id(0)
        i = pl.program_id(1)

        @pl.when(i == 0)
        def _():
            pmn_ref[...] = jnp.full(pmn_ref.shape, jnp.inf, jnp.float32)
            pmx_ref[...] = jnp.full(pmx_ref.shape, -jnp.inf, jnp.float32)

        x = x_ref[...].astype(jnp.float32)
        if tail_rows:   # static: only compiled in when rows % tile_rows != 0
            blk = jnp.minimum(c * spc + i, nb - 1)
            row = jax.lax.broadcasted_iota(jnp.int32, x.shape, 0)
            valid = (blk < nb - 1) | (row < tail_rows)
            xmin = jnp.where(valid, x, jnp.inf)
            xmax = jnp.where(valid, x, -jnp.inf)
        else:
            xmin = xmax = x

        pmn_ref[...] = jnp.minimum(pmn_ref[...], jnp.min(xmin))
        pmx_ref[...] = jnp.maximum(pmx_ref[...], jnp.max(xmax))

    return kernel


def _quant_kernel(pmn_ref, pmx_ref, x_ref, o_ref):
    """Pass 2 (tiled path): elementwise fake-quantize; reduce the tiny per-core partials in-kernel."""
    mn = jnp.min(pmn_ref[...]) - EPS
    mx = jnp.max(pmx_ref[...]) + EPS
    o_ref[...] = _fake_quant(x_ref[...].astype(jnp.float32), mn, mx).astype(o_ref.dtype)


# ----------------------------------------------------------------------------- wrappers
def _tiled_quant(x2d, out_dtype, vmem_budget, target_tile_bytes):
    """Two-pass streaming fake-quant on a lane-dense (rows, cols) view (cols % 128 == 0)."""
    rows, cols = x2d.shape
    dsize = x2d.dtype.itemsize
    tile_rows = max(8, (target_tile_bytes // (cols * dsize) // 8) * 8)
    tile_rows = min(tile_rows, _round_up(rows, 8))
    nb = _cdiv(rows, tile_rows)             # total row-blocks
    spc = _cdiv(nb, _NCORES)                # row-blocks per (virtual) core; clamp dupes are idempotent
    tail_valid = rows - (nb - 1) * tile_rows
    tail = 0 if tail_valid == tile_rows else tail_valid

    partial_shape = (_NCORES, 8, LANES)

    # Pass 1: global min/max (manual 2-way megacore split of the reduction axis).
    pmn, pmx = pl.pallas_call(
        _make_minmax_kernel(nb, spc, tail),
        grid=(_NCORES, spc),
        in_specs=[pl.BlockSpec(
            (tile_rows, cols),
            lambda c, i: (jnp.minimum(c * spc + i, nb - 1), 0))],
        out_specs=[pl.BlockSpec((1, 8, LANES), lambda c, i: (c, 0, 0)),
                   pl.BlockSpec((1, 8, LANES), lambda c, i: (c, 0, 0))],
        out_shape=[jax.ShapeDtypeStruct(partial_shape, jnp.float32),
                   jax.ShapeDtypeStruct(partial_shape, jnp.float32)],
        compiler_params=pltpu.CompilerParams(
            dimension_semantics=("parallel", "arbitrary"),
            vmem_limit_bytes=vmem_budget),
    )(x2d)

    # Pass 2: elementwise quantize/dequantize (embarrassingly parallel -> megacore on v7x).
    return pl.pallas_call(
        _quant_kernel,
        grid=(nb,),
        in_specs=[
            pl.BlockSpec(partial_shape, lambda i: (0, 0, 0)),
            pl.BlockSpec(partial_shape, lambda i: (0, 0, 0)),
            pl.BlockSpec((tile_rows, cols), lambda i: (i, 0)),
        ],
        out_specs=pl.BlockSpec((tile_rows, cols), lambda i: (i, 0)),
        out_shape=jax.ShapeDtypeStruct((rows, cols), out_dtype),
        compiler_params=pltpu.CompilerParams(
            dimension_semantics=("parallel",),
            vmem_limit_bytes=vmem_budget),
    )(pmn, pmx, x2d)


def quant_measure(x, *, fused_bytes_threshold=None, target_tile_bytes=None):
    """JAX/Pallas equivalent of QuantMeasure.forward (stochastic=False, inplace=False)."""
    orig_shape = x.shape
    orig_dtype = x.dtype
    n = x.size
    budget = _vmem_budget_bytes()
    if fused_bytes_threshold is None:
        # Fused kernel keeps input + output + a couple of f32 temps resident -> ~budget/6 of f32 bytes.
        fused_bytes_threshold = budget // 6
    if target_tile_bytes is None:
        target_tile_bytes = _TARGET_TILE_BYTES

    # ---------------- Fused single-pass path (tensor fits in VMEM) ----------------
    if n * 4 <= fused_bytes_threshold:
        x2d = _best_2d_view(x)
        if x2d.shape[0] >= 8 or n <= 64 * 1024:   # avoid pathological sublane waste on big ragged 1-D
            out = pl.pallas_call(
                _fused_kernel,
                out_shape=jax.ShapeDtypeStruct(x2d.shape, orig_dtype),
                compiler_params=pltpu.CompilerParams(vmem_limit_bytes=budget),
            )(x2d)
            return out.reshape(orig_shape)

    # ---------------- Two-pass tiled streaming path (large tensors) ----------------
    flat = x.reshape(-1)
    cols = _lane_dense_cols(n)
    if cols is None:
        # TODO(synk): rare ragged case (n has no multiple-of-128 divisor). Pad with the first
        # element (global min/max unaffected) and slice; costs one extra copy of input + output.
        pad = (-n) % LANES
        flat = jnp.concatenate([flat, jnp.broadcast_to(flat[0], (pad,))])
        q2d = _tiled_quant(flat.reshape(-1, LANES), orig_dtype, budget, target_tile_bytes)
        return q2d.reshape(-1)[:n].reshape(orig_shape)

    q2d = _tiled_quant(flat.reshape(-1, cols), orig_dtype, budget, target_tile_bytes)
    return q2d.reshape(orig_shape)


def quant_measure_ref(x):
    """Pure-JAX reference of the PyTorch forward, for correctness check."""
    xf = x.astype(jnp.float32)
    mn = jnp.min(xf) - EPS
    mx = jnp.max(xf) + EPS
    scale = NUM_BINS / (mx - mn)
    q = jnp.round(jnp.clip((xf - mn) * scale, QN, QP))
    return (q / scale + mn).astype(x.dtype)


if __name__ == "__main__":
    key = jax.random.PRNGKey(0)
    ks = jax.random.split(key, 4)

    # 1) Small NCHW activation (batch=2, channels=4, spatial=16x16): fused VMEM-resident path.
    x_small = jax.random.normal(ks[0], (2, 4, 16, 16), dtype=jnp.float32)
    y = quant_measure(x_small)
    jax.block_until_ready(y)
    assert y.shape == x_small.shape and y.dtype == x_small.dtype
    assert jnp.allclose(y, quant_measure_ref(x_small), atol=1e-5, rtol=1e-5), \
        "fused path mismatch vs reference"

    # 2) Fused fallback for a ragged (no multiple-of-128 divisor) tensor.
    x_odd = jax.random.normal(ks[1], (7, 13, 5), dtype=jnp.float32)
    y = quant_measure(x_odd)
    jax.block_until_ready(y)
    assert jnp.allclose(y, quant_measure_ref(x_odd), atol=1e-5, rtol=1e-5), \
        "fused ragged-fallback mismatch vs reference"

    # 3) Two-pass streaming path (forced via threshold=0, small tiles so the grid has several
    #    steps per core -> exercises the running min/max accumulation and the 2-core split).
    x_big = jax.random.normal(ks[2], (8, 8, 64, 64), dtype=jnp.float32)
    y = quant_measure(x_big, fused_bytes_threshold=0, target_tile_bytes=64 * 1024)
    jax.block_until_ready(y)
    assert y.shape == x_big.shape and y.dtype == x_big.dtype
    assert jnp.allclose(y, quant_measure_ref(x_big), atol=1e-5, rtol=1e-5), \
        "tiled path mismatch vs reference"

    # 4) Two-pass path with a ragged last row-block (exercises the +inf/-inf tail masking).
    x_tail = jax.random.normal(ks[3], (3, 5, 64, 64), dtype=jnp.float32)
    y = quant_measure(x_tail, fused_bytes_threshold=0, target_tile_bytes=64 * 1024)
    jax.block_until_ready(y)
    assert jnp.allclose(y, quant_measure_ref(x_tail), atol=1e-5, rtol=1e-5), \
        "tiled ragged-tail mismatch vs reference"

    print("KERNEL_OK")
</pallas_src>

<mosaic_0001>
module attributes {stable_mosaic.version = 11 : i64} {
  func.func @_fused_kernel(%arg0: memref<1x2048xf32, #tpu.memory_space<vmem>>, %arg1: memref<1x2048xf32, #tpu.memory_space<vmem>>) attributes {dimension_semantics = [], scalar_prefetch = 0 : i64, scratch_operands = 0 : i64, tpu.core_type = #tpu.core_type<tc>} {
    %c0 = arith.constant 0 : index
    %c0_0 = arith.constant 0 : index
    %0 = vector.load %arg0[%c0, %c0_0] : memref<1x2048xf32, #tpu.memory_space<vmem>>, vector<1x2048xf32>
    %1 = vector.shape_cast %0 : vector<1x2048xf32> to vector<1x1x2048xf32>
    %cst = arith.constant dense<0x7F800000> : vector<1xf32>
    %2 = vector.multi_reduction <minimumf>, %1, %cst [1, 2] : vector<1x1x2048xf32> to vector<1xf32>
    %3 = vector.shape_cast %2 : vector<1xf32> to vector<1x1x1xf32>
    %4 = vector.extract %3[0, 0, 0] : f32 from vector<1x1x1xf32>
    %cst_1 = arith.constant 9.99999993E-9 : f32
    %5 = arith.subf %4, %cst_1 : f32
    %6 = vector.shape_cast %0 : vector<1x2048xf32> to vector<1x1x2048xf32>
    %cst_2 = arith.constant dense<0xFF800000> : vector<1xf32>
    %7 = vector.multi_reduction <maximumf>, %6, %cst_2 [1, 2] : vector<1x1x2048xf32> to vector<1xf32>
    %8 = vector.shape_cast %7 : vector<1xf32> to vector<1x1x1xf32>
    %9 = vector.extract %8[0, 0, 0] : f32 from vector<1x1x1xf32>
    %cst_3 = arith.constant 9.99999993E-9 : f32
    %10 = arith.addf %9, %cst_3 : f32
    %11 = arith.subf %10, %5 : f32
    %cst_4 = arith.constant 2.550000e+02 : f32
    %12 = arith.divf %cst_4, %11 : f32
    %13 = arith.subf %10, %5 : f32
    %cst_5 = arith.constant 2.550000e+02 : f32
    %14 = arith.divf %13, %cst_5 : f32
    %15 = vector.broadcast %5 : f32 to vector<1x2048xf32>
    %16 = arith.subf %0, %15 : vector<1x2048xf32>
    %17 = vector.broadcast %12 : f32 to vector<1x2048xf32>
    %18 = arith.mulf %16, %17 : vector<1x2048xf32>
    %cst_6 = arith.constant 0.000000e+00 : f32
    %cst_7 = arith.constant 2.550000e+02 : f32
    %19 = vector.broadcast %cst_6 : f32 to vector<1x2048xf32>
    %20 = arith.maximumf %19, %18 : vector<1x2048xf32>
    %21 = vector.broadcast %cst_7 : f32 to vector<1x2048xf32>
    %22 = arith.minimumf %21, %20 : vector<1x2048xf32>
    %23 = math.roundeven %22 : vector<1x2048xf32>
    %24 = vector.broadcast %14 : f32 to vector<1x2048xf32>
    %25 = arith.mulf %23, %24 : vector<1x2048xf32>
    %26 = vector.broadcast %5 : f32 to vector<1x2048xf32>
    %27 = arith.addf %25, %26 : vector<1x2048xf32>
    %c0_8 = arith.constant 0 : index
    %c0_9 = arith.constant 0 : index
    %28 = vector.load %arg1[%c0_8, %c0_9] : memref<1x2048xf32, #tpu.memory_space<vmem>>, vector<1x2048xf32>
    tpu.vector_store %arg1[%c0_8, %c0_9], %27 {strides = array<i32>} : memref<1x2048xf32, #tpu.memory_space<vmem>>, vector<1x2048xf32>,
    return
  }
}

</mosaic_0001>

<bundles_post_ra>
// kernel: tpu_custom_call.1
= control target key start
LH: loop header
LB: loop body
LE: loop exit
PB: predicated region body
PF: predicated region fallthrough
CT: control target
= control target key end

     0   :  { %6 = vsyncpa [#allocation3], 0  ;;  %s369_s0 = inlined_call_operand.hbm [shape: f32[1,2048], index: 0, kind: input, shape index: {}]   ;;  %s370_s1 = inlined_call_operand.hbm [shape: f32[1,2048], index: 1, kind: output, shape index: {}]  }
   0x1   :  { %7 = vsyncpa [#allocation4], 0  ;;  %s13_s8 = sshll.u32 %s369_s0, 4  ;;  %s289_s9 = smov [#allocation2]   ;;  %s14_s8 = int_to_ptr.hbm [resolvable:$true] %s13_s8 }
   0x2   :  { %s15_s10 = sshll.u32 %s289_s9, 4  ;;  %s16_s10 = int_to_ptr.vmem [resolvable:$true] %s15_s10 }
   0x3   :  { %18 = dma.hbm_to_vmem [thread:$0]  %s14_s8, 256, %s16_s10, [#allocation3]  }
   0x4   :  { %285 = dma.done.wait [#allocation3], 256  }
   0x5   :  { %286 = vsyncadd [#allocation3], 4294967040  ;;  %v305_v0 = vld [vmem:[#allocation2] sm:$0xff]  ;;  %v307_v1 = vld [vmem:[#allocation2 + $0x8] sm:$0xff]  ;;  %vm59_vm0 = vcmask 1040384   ;;  %s291_s19 = smov [#allocation5]  }
   0x6   :  { %v27_v2 = vperm.slane %v305_v0, 0  ;;  %v28_v3 = vperm.slane %v305_v0, 1  ;;  %v29_v4 = vperm.slane %v305_v0, 2  ;;  %v30_v5 = vperm.slane %v305_v0, 3  ;;  %s193_s20 = sshll.u32 %s291_s19, 4  ;;  %s195_s23 = sshll.u32 %s370_s1, 4  ;;  %s194_s20 = int_to_ptr.vmem [resolvable:$true] %s193_s20  ;;  %s196_s23 = int_to_ptr.hbm [resolvable:$true] %s195_s23 }
   0x7   :  { %v31_v6 = vperm.slane %v305_v0, 4  ;;  %v32_v7 = vperm.slane %v305_v0, 5  ;;  %v33_v8 = vperm.slane %v305_v0, 6  ;;  %v34_v9 = vperm.slane %v305_v0, 7 }
   0x8   :  { %v35_v10 = vperm.slane %v307_v1, 0  ;;  %v36_v11 = vperm.slane %v307_v1, 1  ;;  %v37_v12 = vperm.slane %v307_v1, 2  ;;  %v38_v13 = vperm.slane %v307_v1, 3 }
   0x9   :  { %v39_v14 = vperm.slane %v307_v1, 4  ;;  %v40_v15 = vperm.slane %v307_v1, 5  ;;  %v41_v16 = vperm.slane %v307_v1, 6  ;;  %v42_v17 = vperm.slane %v307_v1, 7 }
   0xa   :  { %v60_v18 = vsel %vm59_vm0, %v27_v2, inf  ;;  %v61_v19 = vsel %vm59_vm0, %v28_v3, inf  ;;  %v62_v20 = vsel %vm59_vm0, %v29_v4, inf  ;;  %v63_v21 = vsel %vm59_vm0, %v30_v5, inf }
   0xb   :  { %v64_v22 = vsel %vm59_vm0, %v31_v6, inf  ;;  %v66_v23 = vsel %vm59_vm0, %v32_v7, inf  ;;  %v68_v24 = vsel %vm59_vm0, %v33_v8, inf  ;;  %v70_v25 = vsel %vm59_vm0, %v34_v9, inf }
   0xc   :  { %v65_v26 = vmin.f32 %v60_v18, %v64_v22  ;;  %v67_v27 = vmin.f32 %v61_v19, %v66_v23  ;;  %v69_v28 = vmin.f32 %v62_v20, %v68_v24  ;;  %v71_v29 = vmin.f32 %v63_v21, %v70_v25 }
   0xd   :  { %v72_v30 = vsel %vm59_vm0, %v35_v10, inf  ;;  %v74_v31 = vsel %vm59_vm0, %v36_v11, inf  ;;  %v76_v32 = vsel %vm59_vm0, %v37_v12, inf  ;;  %v78_v33 = vsel %vm59_vm0, %v38_v13, inf }
   0xe   :  { %v73_v34 = vmin.f32 %v65_v26, %v72_v30  ;;  %v75_v35 = vmin.f32 %v67_v27, %v74_v31  ;;  %v77_v36 = vmin.f32 %v69_v28, %v76_v32  ;;  %v79_v37 = vmin.f32 %v71_v29, %v78_v33 }
   0xf   :  { %v80_v38 = vsel %vm59_vm0, %v39_v14, inf  ;;  %v82_v39 = vsel %vm59_vm0, %v40_v15, inf  ;;  %v84_v40 = vsel %vm59_vm0, %v41_v16, inf  ;;  %v86_v41 = vsel %vm59_vm0, %v42_v17, inf }
  0x10   :  { %v81_v42 = vmin.f32 %v73_v34, %v80_v38  ;;  %v83_v43 = vmin.f32 %v75_v35, %v82_v39  ;;  %v85_v44 = vmin.f32 %v77_v36, %v84_v40  ;;  %v87_v45 = vmin.f32 %v79_v37, %v86_v41 }
  0x11   :  { %v101_v46 = vsel %vm59_vm0, %v27_v2, -inf  ;;  %v102_v47 = vsel %vm59_vm0, %v28_v3, -inf  ;;  %v103_v48 = vsel %vm59_vm0, %v29_v4, -inf  ;;  %v104_v49 = vsel %vm59_vm0, %v30_v5, -inf }
  0x12   :  { %v88_v50 = vmin.f32 %v81_v42, %v83_v43  ;;  %v89_v51 = vmin.f32 %v85_v44, %v87_v45  ;;  %v105_v52 = vsel %vm59_vm0, %v31_v6, -inf  ;;  %v107_v53 = vsel %vm59_vm0, %v32_v7, -inf }
  0x13   :  { %v106_v54 = vmax.f32 %v101_v46, %v105_v52  ;;  %v108_v55 = vmax.f32 %v102_v47, %v107_v53  ;;  %v109_v56 = vsel %vm59_vm0, %v33_v8, -inf  ;;  %v111_v57 = vsel %vm59_vm0, %v34_v9, -inf }
  0x14   :  { %v90_v58 = vmin.f32 %v88_v50, %v89_v51  ;;  %v110_v59 = vmax.f32 %v103_v48, %v109_v56  ;;  %v112_v60 = vmax.f32 %v104_v49, %v111_v57  ;;  %v113_v61 = vsel %vm59_vm0, %v35_v10, -inf }
  0x15   :  { %v114_v62 = vmax.f32 %v106_v54, %v113_v61  ;;  %v115_v63 = vsel %vm59_vm0, %v36_v11, -inf  ;;  %v117_v2 = vsel %vm59_vm0, %v37_v12, -inf  ;;  %v119_v3 = vsel %vm59_vm0, %v38_v13, -inf }
  0x16   :  { %91 = vmin.xlane.f32.xlu0 %v90_v58  ;;  %v116_v4 = vmax.f32 %v108_v55, %v115_v63  ;;  %v118_v5 = vmax.f32 %v110_v59, %v117_v2  ;;  %v120_v6 = vmax.f32 %v112_v60, %v119_v3  ;;  %v121_v7 = vsel %vm59_vm0, %v39_v14, -inf }
  0x17   :  { %v122_v8 = vmax.f32 %v114_v62, %v121_v7  ;;  %v123_v9 = vsel %vm59_vm0, %v40_v15, -inf  ;;  %v125_v18 = vsel %vm59_vm0, %v41_v16, -inf  ;;  %v127_v10 = vsel %vm59_vm0, %v42_v17, -inf }
  0x18   :  { %v124_v19 = vmax.f32 %v116_v4, %v123_v9  ;;  %v126_v20 = vmax.f32 %v118_v5, %v125_v18  ;;  %v128_v11 = vmax.f32 %v120_v6, %v127_v10  ;;  %v290_v32 = vmov 255.0  }
  0x19   :  { %233 = vrcp.f32 %v290_v32 }
  0x1a   :  { %v129_v21 = vmax.f32 %v122_v8, %v124_v19  ;;  %v130_v12 = vmax.f32 %v126_v20, %v128_v11 }
  0x1c   :  { %v131_v22 = vmax.f32 %v129_v21, %v130_v12 }
  0x1e   :  { %132 = vmax.xlane.f32.xlu0 %v131_v22 }
  0x1f   :  { %v234_v33 = vpop.eup %233 }
  0x20   :  { %v161_v35 = vmul.f32 255.0, %v234_v33  ;;  %vm165_vm2 = vweird.f32 %v234_v33 }
  0x22   :  { %v162_v36 = vsub.f32 1.0, %v161_v35 }
  0x24   :  { %v163_v39 = vmul.f32 %v234_v33, %v162_v36 }
  0x26   :  { %v164_v44 = vadd.f32 %v234_v33, %v163_v39 }
  0x28   :  { %v166_v48 = vsel %vm165_vm2, %v234_v33, %v164_v44 }
  0x89   :  { %v92_v13 = vpop.xlane.xlu0 %91 }
  0x8a   :  { %v93_v23 = vrot.slane %v92_v13, 4 }
  0x8c   :  { %v94_v24 = vmin.f32 %v92_v13, %v93_v23 }
  0x8e   :  { %v95_v25 = vrot.slane %v94_v24, 2 }
  0x90   :  { %v96_v26 = vmin.f32 %v94_v24, %v95_v25 }
  0x91   :  { %v133_v14 = vpop.xlane.xlu0 %132 }
  0x92   :  { %v134_v27 = vrot.slane %v133_v14, 4  ;;  %v97_v28 = vrot.slane %v96_v26, 1 }
  0x94   :  { %v135_v15 = vmax.f32 %v133_v14, %v134_v27  ;;  %v98_v29 = vmin.f32 %v96_v26, %v97_v28 }
  0x96   :  { %v136_v16 = vrot.slane %v135_v15, 2  ;;  %206 = vpush %v98_v29 }
  0x98   :  { %v137_v17 = vmax.f32 %v135_v15, %v136_v16 }
  0x9a   :  { %v138_v30 = vrot.slane %v137_v17, 1 }
  0x9c   :  { %v139_v31 = vmax.f32 %v137_v17, %v138_v30 }
  0x9e   :  { %208 = vpush %v139_v31 }
  0xc7   :  { %s357_s0 = spop %206 }
  0xc8   :  { %s205_s11 = sadd.f32 -1e-08, %s357_s0 }
  0xca   :  { %v169_v50 = vstv %s205_s11 }
  0xcb   :  { %v170_v51 = vsub.f32 %v305_v0, %v169_v50  ;;  %v171_v52 = vsub.f32 %v307_v1, %v169_v50 }
  0xcf   :  { %s209_s12 = spop %208 }
  0xd0   :  { %s141_s13 = sadd.f32 1e-08, %s209_s12 }
  0xd2   :  { %s360_s14 = ssub.f32 %s141_s13, %s205_s11 }
  0xd4   :  { %v143_v34 = vstv %s360_s14 }
  0xd5   :  { %235 = vrcp.f32 %v143_v34  ;;  %v155_v41 = vand.u32 2147483648, %v143_v34  ;;  %v153_v43 = vand.u32 2147483647, %v143_v34  ;;  %vm149_vm3 = vweird.f32 %v143_v34 }
  0xd7   :  { %v156_v46 = vor.u32 1.1754944e-38, %v155_v41  ;;  %vm154_vm5 = vcmp.eq.f32.partialorder %v153_v43, 8.507059e+37 }
  0xdb   :  { %v236_v37 = vpop.eup %235 }
  0xdc   :  { %v145_v38 = vmul.f32 %v236_v37, %v143_v34  ;;  %vm150_vm1 = vweird.f32 %v236_v37 }
  0xdd   :  { %vm151_vm4 = vmor %vm149_vm3, %vm150_vm1 }
  0xde   :  { %v146_v40 = vsub.f32 1.0, %v145_v38 }
  0xe0   :  { %v147_v42 = vmul.f32 %v236_v37, %v146_v40 }
  0xe2   :  { %v148_v45 = vadd.f32 %v236_v37, %v147_v42 }
  0xe4   :  { %v152_v47 = vsel %vm151_vm4, %v236_v37, %v148_v45 }
  0xe5   :  { %v157_v49 = vsel %vm154_vm5, %v156_v46, %v152_v47 }
  0xe6   :  { %210 = vpush %v157_v49 }
  0xe7   :  { %212 = vpush %v166_v48 }
 0x117   :  { %s211_s15 = spop %210 }
 0x118   :  { %s159_s16 = smul.f32 255.0, %s211_s15  ;;  %s213_s17 = spop %212 }
 0x119   :  { %s168_s18 = smul.f32 %s213_s17, %s360_s14 }
 0x11a   :  { %v172_v53 = vstv %s159_s16 }
 0x11b   :  { %v173_v54 = vmul.f32 %v172_v53, %v170_v51  ;;  %v174_v55 = vmul.f32 %v172_v53, %v171_v52  ;;  %v181_v9 = vstv %s168_s18 }
 0x11d   :  { %v175_v56 = vmax.f32 %v173_v54, 0.0  ;;  %v176_v57 = vmax.f32 %v174_v55, 0.0 }
 0x11f   :  { %v177_v58 = vmin.f32 %v175_v56, 255.0  ;;  %v178_v59 = vmin.f32 %v176_v57, 255.0 }
 0x121   :  { %v216_v60 = vcvt.f32.s32 %v177_v58  ;;  %v224_v61 = vcvt.f32.s32 %v178_v59  ;;  %v214_v63 = vand.u32 2147483647, %v177_v58  ;;  %v219_v4 = vand.u32 2147483648, %v177_v58 }
 0x122   :  { %v222_v5 = vand.u32 2147483647, %v178_v59  ;;  %v227_v6 = vand.u32 2147483648, %v178_v59 }
 0x123   :  { %v217_v62 = vcvt.s32.f32 %v216_v60  ;;  %v225_v2 = vcvt.s32.f32 %v224_v61  ;;  %vm215_vm6 = vcmp.lt.f32.partialorder %v214_v63, 8388608.0 }
 0x124   :  { %vm223_vm7 = vcmp.lt.f32.partialorder %v222_v5, 8388608.0 }
 0x125   :  { %v218_v3 = vand.u32 2147483647, %v217_v62  ;;  %v226_v0 = vand.u32 2147483647, %v225_v2 }
 0x127   :  { %v220_v1 = vor.u32 %v219_v4, %v218_v3  ;;  %v228_v7 = vor.u32 %v227_v6, %v226_v0 }
 0x129   :  { %v221_v8 = vsel %vm215_vm6, %v220_v1, %v177_v58  ;;  %v229_v18 = vsel %vm223_vm7, %v228_v7, %v178_v59 }
 0x12a   :  { %v182_v10 = vmul.f32 %v221_v8, %v181_v9  ;;  %v183_v19 = vmul.f32 %v229_v18, %v181_v9 }
 0x12c   :  { %v184_v20 = vadd.f32 %v182_v10, %v169_v50  ;;  %v185_v11 = vadd.f32 %v183_v19, %v169_v50 }
 0x12e   :  { %186 = vst [vmem:[#allocation5] sm:$0xff] %v184_v20 }
 0x12f   :  { %187 = vst [vmem:[#allocation5 + $0x8] sm:$0xff] %v185_v11 }
 0x130   :  { %198 = dma.vmem_to_hbm [thread:$0]  %s194_s20, 256, %s196_s23, [#allocation4]  }
 0x131   :  { %287 = dma.done.wait [#allocation4], 256  }
 0x132   :  { %288 = vsyncadd [#allocation4], 4294967040 }
 0x133   :  { %203 = vsyncpa [#allocation3], 1 }
 0x134   :  { %204 = vsyncpa [#allocation4], 1 }

</bundles_post_ra>
